<compile_context>
chip_gen: v7x
topology: tpu7x:2x2x1
jax: 0.10.0
libtpu: 0.0.40
codegen_flags: <defaults>
</compile_context>

<pallas_src>
import functools

import jax
import jax.numpy as jnp
from jax.experimental import pallas as pl
from jax.experimental.pallas import tpu as pltpu

LN_EPS = 1e-5   # torch.nn.LayerNorm default
LANE = 128      # TPU lane width


def _round_up(x, m):
    return ((x + m - 1) // m) * m


def _ln_relu(h, gamma, beta, true_width):
    """Fused LayerNorm(+ReLU) over the last axis.

    `h` may be lane-padded with zeros beyond `true_width`; gamma/beta are zero
    in the padded lanes, so padded outputs stay exactly 0 after ReLU.
    Single-pass statistics: the two sums are independent and issue back-to-back
    on the XLU instead of two dependent reduction passes.
    """
    inv_n = 1.0 / true_width
    s = jnp.sum(h, axis=-1, keepdims=True)
    ss = jnp.sum(h * h, axis=-1, keepdims=True)
    mu = s * inv_n
    var = ss * inv_n - mu * mu
    y = (h - mu) * jax.lax.rsqrt(var + LN_EPS) * gamma + beta
    return jnp.maximum(y, 0.0)


def actor_kernel(x_ref,
                 w1_ref, bgb1_ref,
                 w2_ref, bgb2_ref,
                 w3_ref, b3_ref,
                 out_ref,
                 *, ln1_width, ln2_width):
    # NOTE: for scaled-up models cast matmul operands to bf16 here (keep
    # preferred_element_type=jnp.float32 and the LN/tanh epilogue in f32).
    x = x_ref[...]

    # fc1 -> LayerNorm -> ReLU   (bgb = [bias; gamma; beta] packed rows)
    h = jnp.dot(x, w1_ref[...], preferred_element_type=jnp.float32)
    h = h + bgb1_ref[0:1, :]
    h = _ln_relu(h, bgb1_ref[1:2, :], bgb1_ref[2:3, :], ln1_width)

    # fc2 -> LayerNorm -> ReLU
    h = jnp.dot(h, w2_ref[...], preferred_element_type=jnp.float32)
    h = h + bgb2_ref[0:1, :]
    h = _ln_relu(h, bgb2_ref[1:2, :], bgb2_ref[2:3, :], ln2_width)

    # action head -> tanh (lane-dense 128-wide store; wrapper slices it)
    a = jnp.dot(h, w3_ref[...], preferred_element_type=jnp.float32) + b3_ref[...]
    out_ref[...] = jnp.tanh(a).astype(out_ref.dtype)


def actor_forward(state, packed):
    """Run the Pallas Actor forward.  `packed` comes from pack_actor_params."""
    batch = state.shape[0]
    s_pad = packed["w1"].shape[0]
    a_pad = packed["w3"].shape[1]
    action_dim = packed["action_dim"]

    # Lane-pad the state so the input DMA and first matmul are unmasked.
    x = state
    if x.shape[1] != s_pad:
        x = jnp.pad(x, ((0, 0), (0, s_pad - x.shape[1])))

    kernel = functools.partial(
        actor_kernel,
        ln1_width=float(packed["ln1_width"]),
        ln2_width=float(packed["ln2_width"]),
    )

    vmem = pl.BlockSpec(memory_space=pltpu.MemorySpace.VMEM)
    args = (x,
            packed["w1"], packed["bgb1"],
            packed["w2"], packed["bgb2"],
            packed["w3"], packed["b3"])

    out = pl.pallas_call(
        kernel,
        out_shape=jax.ShapeDtypeStruct((batch, a_pad), jnp.float32),
        in_specs=[vmem] * len(args),
        out_specs=vmem,
    )(*args)
    return out[:, :action_dim]


def init_actor_params(key, state_dim, action_dim, fc1_dim, fc2_dim):
    """Deterministic init mirroring weight_init: xavier_normal_ for Linear
    weights, zero biases; LayerNorm gamma=1, beta=0 (torch default).
    Returns TRUE-shaped (unpadded) parameters; use pack_actor_params for the
    kernel-ready padded/packed versions."""
    k1, k2, k3 = jax.random.split(key, 3)

    def xavier_normal(k, fan_in, fan_out):
        std = (2.0 / (fan_in + fan_out)) ** 0.5
        # stored as (in, out) == transpose of torch's (out, in) weight
        return std * jax.random.normal(k, (fan_in, fan_out), dtype=jnp.float32)

    return {
        "w1": xavier_normal(k1, state_dim, fc1_dim),
        "b1": jnp.zeros((1, fc1_dim), jnp.float32),
        "g1": jnp.ones((1, fc1_dim), jnp.float32),
        "be1": jnp.zeros((1, fc1_dim), jnp.float32),
        "w2": xavier_normal(k2, fc1_dim, fc2_dim),
        "b2": jnp.zeros((1, fc2_dim), jnp.float32),
        "g2": jnp.ones((1, fc2_dim), jnp.float32),
        "be2": jnp.zeros((1, fc2_dim), jnp.float32),
        "w3": xavier_normal(k3, fc2_dim, action_dim),
        "b3": jnp.zeros((1, action_dim), jnp.float32),
    }


def pack_actor_params(p, state_dim, action_dim, fc1_dim, fc2_dim, lane=LANE):
    """Zero-pad all feature dims to multiples of 128 and pack each layer's
    (bias, gamma, beta) into a single (3, N) array.  Zero-padding is exact for
    the matmuls; LN correctness is preserved because the kernel divides by the
    true width and padded gamma/beta lanes are zero."""
    sp = _round_up(state_dim, lane)
    f1 = _round_up(fc1_dim, lane)
    f2 = _round_up(fc2_dim, lane)
    ap = _round_up(action_dim, lane)

    def pad2(x, rows, cols):
        return jnp.pad(x, ((0, rows - x.shape[0]), (0, cols - x.shape[1])))

    bgb1 = jnp.concatenate([p["b1"], p["g1"], p["be1"]], axis=0)  # (3, fc1)
    bgb2 = jnp.concatenate([p["b2"], p["g2"], p["be2"]], axis=0)  # (3, fc2)

    return {
        "w1": pad2(p["w1"], sp, f1),
        "bgb1": pad2(bgb1, 3, f1),
        "w2": pad2(p["w2"], f1, f2),
        "bgb2": pad2(bgb2, 3, f2),
        "w3": pad2(p["w3"], f2, ap),
        "b3": pad2(p["b3"], 1, ap),
        "ln1_width": fc1_dim,
        "ln2_width": fc2_dim,
        "action_dim": action_dim,
        "state_dim": state_dim,
    }


def _layernorm_ref(h, gamma, beta):
    mu = jnp.mean(h, axis=-1, keepdims=True)
    var = jnp.mean((h - mu) * (h - mu), axis=-1, keepdims=True)
    return (h - mu) * jax.lax.rsqrt(var + LN_EPS) * gamma + beta


def actor_ref(state, p):
    """Pure-JAX reference (unpadded, two-pass LN) for sanity checking."""
    h = state @ p["w1"] + p["b1"]
    h = jnp.maximum(_layernorm_ref(h, p["g1"], p["be1"]), 0.0)
    h = h @ p["w2"] + p["b2"]
    h = jnp.maximum(_layernorm_ref(h, p["g2"], p["be2"]), 0.0)
    return jnp.tanh(h @ p["w3"] + p["b3"])


if __name__ == "__main__":
    state_dim, action_dim, fc1_dim, fc2_dim = 16, 4, 32, 32
    batch = 8

    key = jax.random.PRNGKey(0)
    k_params, k_state = jax.random.split(key)
    params = init_actor_params(k_params, state_dim, action_dim, fc1_dim, fc2_dim)
    packed = pack_actor_params(params, state_dim, action_dim, fc1_dim, fc2_dim)
    state = jax.random.normal(k_state, (batch, state_dim), dtype=jnp.float32)

    out = actor_forward(state, packed)
    out = jax.block_until_ready(out)

    ref = actor_ref(state, params)
    assert out.shape == (batch, action_dim)
    assert jnp.allclose(out, ref, atol=2e-5, rtol=1e-5)

    print("KERNEL_OK")
</pallas_src>

<mosaic_0001>
module attributes {stable_mosaic.version = 11 : i64} {
  func.func @actor_kernel(%arg0: memref<8x128xf32, #tpu.memory_space<vmem>>, %arg1: memref<128x128xf32, #tpu.memory_space<vmem>>, %arg2: memref<3x128xf32, #tpu.memory_space<vmem>>, %arg3: memref<128x128xf32, #tpu.memory_space<vmem>>, %arg4: memref<3x128xf32, #tpu.memory_space<vmem>>, %arg5: memref<128x128xf32, #tpu.memory_space<vmem>>, %arg6: memref<1x128xf32, #tpu.memory_space<vmem>>, %arg7: memref<8x128xf32, #tpu.memory_space<vmem>>) attributes {dimension_semantics = [], scalar_prefetch = 0 : i64, scratch_operands = 0 : i64, tpu.core_type = #tpu.core_type<tc>} {
    %c0 = arith.constant 0 : index
    %c0_0 = arith.constant 0 : index
    %0 = vector.load %arg0[%c0, %c0_0] : memref<8x128xf32, #tpu.memory_space<vmem>>, vector<8x128xf32>
    %c0_1 = arith.constant 0 : index
    %c0_2 = arith.constant 0 : index
    %1 = vector.load %arg1[%c0_1, %c0_2] : memref<128x128xf32, #tpu.memory_space<vmem>>, vector<128x128xf32>
    %cst = arith.constant dense<0.000000e+00> : vector<8x128xf32>
    %2 = tpu.matmul %0, %1, %cst {dimension_numbers = #tpu.dot_dimension_numbers<[1], [0], [0], [1], [0, 0, 1, 1], [], []>} : vector<8x128xf32>, vector<128x128xf32>, vector<8x128xf32> -> vector<8x128xf32>
    %c0_3 = arith.constant 0 : index
    %c0_4 = arith.constant 0 : index
    %3 = vector.load %arg2[%c0_3, %c0_4] : memref<3x128xf32, #tpu.memory_space<vmem>>, vector<1x128xf32>
    %4 = vector.broadcast %3 : vector<1x128xf32> to vector<8x128xf32>
    %5 = arith.addf %2, %4 : vector<8x128xf32>
    %c1 = arith.constant 1 : index
    %c0_5 = arith.constant 0 : index
    %6 = vector.load %arg2[%c1, %c0_5] : memref<3x128xf32, #tpu.memory_space<vmem>>, vector<1x128xf32>
    %c2 = arith.constant 2 : index
    %c0_6 = arith.constant 0 : index
    %7 = vector.load %arg2[%c2, %c0_6] : memref<3x128xf32, #tpu.memory_space<vmem>>, vector<1x128xf32>
    %cst_7 = arith.constant dense<0.000000e+00> : vector<8xf32>
    %8 = vector.multi_reduction <add>, %5, %cst_7 [1] : vector<8x128xf32> to vector<8xf32>
    %9 = vector.shape_cast %8 : vector<8xf32> to vector<8x1xf32>
    %10 = arith.mulf %5, %5 : vector<8x128xf32>
    %cst_8 = arith.constant dense<0.000000e+00> : vector<8xf32>
    %11 = vector.multi_reduction <add>, %10, %cst_8 [1] : vector<8x128xf32> to vector<8xf32>
    %12 = vector.shape_cast %11 : vector<8xf32> to vector<8x1xf32>
    %cst_9 = arith.constant 3.125000e-02 : f32
    %13 = vector.broadcast %cst_9 : f32 to vector<8x1xf32>
    %14 = arith.mulf %9, %13 : vector<8x1xf32>
    %cst_10 = arith.constant 3.125000e-02 : f32
    %15 = vector.broadcast %cst_10 : f32 to vector<8x1xf32>
    %16 = arith.mulf %12, %15 : vector<8x1xf32>
    %17 = arith.mulf %14, %14 : vector<8x1xf32>
    %18 = arith.subf %16, %17 : vector<8x1xf32>
    %19 = vector.broadcast %14 : vector<8x1xf32> to vector<8x128xf32>
    %20 = arith.subf %5, %19 : vector<8x128xf32>
    %cst_11 = arith.constant 9.99999974E-6 : f32
    %21 = vector.broadcast %cst_11 : f32 to vector<8x1xf32>
    %22 = arith.addf %18, %21 : vector<8x1xf32>
    %23 = math.rsqrt %22 : vector<8x1xf32>
    %24 = vector.broadcast %23 : vector<8x1xf32> to vector<8x128xf32>
    %25 = arith.mulf %20, %24 : vector<8x128xf32>
    %26 = vector.broadcast %6 : vector<1x128xf32> to vector<8x128xf32>
    %27 = arith.mulf %25, %26 : vector<8x128xf32>
    %28 = vector.broadcast %7 : vector<1x128xf32> to vector<8x128xf32>
    %29 = arith.addf %27, %28 : vector<8x128xf32>
    %cst_12 = arith.constant 0.000000e+00 : f32
    %30 = vector.broadcast %cst_12 : f32 to vector<8x128xf32>
    %31 = arith.maximumf %29, %30 : vector<8x128xf32>
    %c0_13 = arith.constant 0 : index
    %c0_14 = arith.constant 0 : index
    %32 = vector.load %arg3[%c0_13, %c0_14] : memref<128x128xf32, #tpu.memory_space<vmem>>, vector<128x128xf32>
    %cst_15 = arith.constant dense<0.000000e+00> : vector<8x128xf32>
    %33 = tpu.matmul %31, %32, %cst_15 {dimension_numbers = #tpu.dot_dimension_numbers<[1], [0], [0], [1], [0, 0, 1, 1], [], []>} : vector<8x128xf32>, vector<128x128xf32>, vector<8x128xf32> -> vector<8x128xf32>
    %c0_16 = arith.constant 0 : index
    %c0_17 = arith.constant 0 : index
    %34 = vector.load %arg4[%c0_16, %c0_17] : memref<3x128xf32, #tpu.memory_space<vmem>>, vector<1x128xf32>
    %35 = vector.broadcast %34 : vector<1x128xf32> to vector<8x128xf32>
    %36 = arith.addf %33, %35 : vector<8x128xf32>
    %c1_18 = arith.constant 1 : index
    %c0_19 = arith.constant 0 : index
    %37 = vector.load %arg4[%c1_18, %c0_19] : memref<3x128xf32, #tpu.memory_space<vmem>>, vector<1x128xf32>
    %c2_20 = arith.constant 2 : index
    %c0_21 = arith.constant 0 : index
    %38 = vector.load %arg4[%c2_20, %c0_21] : memref<3x128xf32, #tpu.memory_space<vmem>>, vector<1x128xf32>
    %cst_22 = arith.constant dense<0.000000e+00> : vector<8xf32>
    %39 = vector.multi_reduction <add>, %36, %cst_22 [1] : vector<8x128xf32> to vector<8xf32>
    %40 = vector.shape_cast %39 : vector<8xf32> to vector<8x1xf32>
    %41 = arith.mulf %36, %36 : vector<8x128xf32>
    %cst_23 = arith.constant dense<0.000000e+00> : vector<8xf32>
    %42 = vector.multi_reduction <add>, %41, %cst_23 [1] : vector<8x128xf32> to vector<8xf32>
    %43 = vector.shape_cast %42 : vector<8xf32> to vector<8x1xf32>
    %cst_24 = arith.constant 3.125000e-02 : f32
    %44 = vector.broadcast %cst_24 : f32 to vector<8x1xf32>
    %45 = arith.mulf %40, %44 : vector<8x1xf32>
    %cst_25 = arith.constant 3.125000e-02 : f32
    %46 = vector.broadcast %cst_25 : f32 to vector<8x1xf32>
    %47 = arith.mulf %43, %46 : vector<8x1xf32>
    %48 = arith.mulf %45, %45 : vector<8x1xf32>
    %49 = arith.subf %47, %48 : vector<8x1xf32>
    %50 = vector.broadcast %45 : vector<8x1xf32> to vector<8x128xf32>
    %51 = arith.subf %36, %50 : vector<8x128xf32>
    %cst_26 = arith.constant 9.99999974E-6 : f32
    %52 = vector.broadcast %cst_26 : f32 to vector<8x1xf32>
    %53 = arith.addf %49, %52 : vector<8x1xf32>
    %54 = math.rsqrt %53 : vector<8x1xf32>
    %55 = vector.broadcast %54 : vector<8x1xf32> to vector<8x128xf32>
    %56 = arith.mulf %51, %55 : vector<8x128xf32>
    %57 = vector.broadcast %37 : vector<1x128xf32> to vector<8x128xf32>
    %58 = arith.mulf %56, %57 : vector<8x128xf32>
    %59 = vector.broadcast %38 : vector<1x128xf32> to vector<8x128xf32>
    %60 = arith.addf %58, %59 : vector<8x128xf32>
    %cst_27 = arith.constant 0.000000e+00 : f32
    %61 = vector.broadcast %cst_27 : f32 to vector<8x128xf32>
    %62 = arith.maximumf %60, %61 : vector<8x128xf32>
    %c0_28 = arith.constant 0 : index
    %c0_29 = arith.constant 0 : index
    %63 = vector.load %arg5[%c0_28, %c0_29] : memref<128x128xf32, #tpu.memory_space<vmem>>, vector<128x128xf32>
    %cst_30 = arith.constant dense<0.000000e+00> : vector<8x128xf32>
    %64 = tpu.matmul %62, %63, %cst_30 {dimension_numbers = #tpu.dot_dimension_numbers<[1], [0], [0], [1], [0, 0, 1, 1], [], []>} : vector<8x128xf32>, vector<128x128xf32>, vector<8x128xf32> -> vector<8x128xf32>
    %c0_31 = arith.constant 0 : index
    %c0_32 = arith.constant 0 : index
    %65 = vector.load %arg6[%c0_31, %c0_32] : memref<1x128xf32, #tpu.memory_space<vmem>>, vector<1x128xf32>
    %66 = vector.broadcast %65 : vector<1x128xf32> to vector<8x128xf32>
    %67 = arith.addf %64, %66 : vector<8x128xf32>
    %68 = math.tanh %67 : vector<8x128xf32>
    %c0_33 = arith.constant 0 : index
    %c0_34 = arith.constant 0 : index
    %69 = vector.load %arg7[%c0_33, %c0_34] : memref<8x128xf32, #tpu.memory_space<vmem>>, vector<8x128xf32>
    tpu.vector_store %arg7[%c0_33, %c0_34], %68 {strides = array<i32>} : memref<8x128xf32, #tpu.memory_space<vmem>>, vector<8x128xf32>,
    return
  }
}

</mosaic_0001>

<bundles_post_ra>
// kernel: tpu_custom_call.1
= control target key start
LH: loop header
LB: loop body
LE: loop exit
PB: predicated region body
PF: predicated region fallthrough
CT: control target
= control target key end

     0   :  { %12 = vsyncpa [#allocation3], 0  ;;  %s963_s0 = inlined_call_operand.hbm [shape: f32[8,128], index: 0, kind: input, shape index: {}]   ;;  %s964_s1 = inlined_call_operand.hbm [shape: f32[128,128], index: 1, kind: input, shape index: {}]   ;;  %s965_s2 = inlined_call_operand.vmem [shape: f32[3,128], index: 2, kind: input, shape index: {}]   ;;  %s966_s3 = inlined_call_operand.hbm [shape: f32[128,128], index: 3, kind: input, shape index: {}]   ;;  %s967_s4 = inlined_call_operand.vmem [shape: f32[3,128], index: 4, kind: input, shape index: {}]   ;;  %s968_s5 = inlined_call_operand.hbm [shape: f32[128,128], index: 5, kind: input, shape index: {}]   ;;  %s969_s6 = inlined_call_operand.vmem [shape: f32[1,128], index: 6, kind: input, shape index: {}]   ;;  %s970_s7 = inlined_call_operand.hbm [shape: f32[8,128], index: 7, kind: output, shape index: {}]  }
   0x1   :  { %13 = vsyncpa [#allocation6], 0 }
   0x2   :  { %14 = vsyncpa [#allocation9], 0 }
   0x3   :  { %15 = vsyncpa [#allocation4], 0  ;;  %s796_s24 = smov [#allocation5]   ;;  %s678_s28 = scalar_lea.hbm %s964_s1, 2048 }
   0x4   :  { %s31_s25 = sshll.u32 %s796_s24, 4  ;;  %p679_p0 = scmp.ne.s32.totalorder %s964_s1, %s678_s28  ;;  %s32_s25 = int_to_ptr.vmem [resolvable:$true] %s31_s25 }
   0x5   :  { %p682_p1 = scmp.lt.u32.totalorder %s678_s28, %s964_s1 }
   0x7   :  { %p684_p2 = pnand %p682_p1, %p679_p0 }
   0x9   :  { %687 = shalt.err (!%p684_p2)
}
   0xa   :  { %s688_s10 = scalar_lea.vmem %s32_s25, 2048  ;;  %p693_p4 = scmp.lt.s32.totalorder %s32_s25, %s32_s25 }
   0xb   :  { %p689_p3 = scmp.ne.s32.totalorder %s32_s25, %s688_s10  ;;  %p694_p5 = scmp.lt.s32.totalorder %s688_s10, %s688_s10 }
   0xd   :  { %p695_p6 = por %p694_p5, %p693_p4 }
   0xf   :  { %p696_p7 = pnand %p695_p6, %p689_p3 }
  0x11   :  { %699 = shalt.err (!%p696_p7)
}
  0x12   :  { %s797_s11 = smov 128   ;;  %s798_s12 = smov 8  }
  0x13   :  { %37 = dma.hbm_to_vmem [thread:$0]  %s964_s1, 2048, %s32_s25, [#allocation6], %s797_s11, %s797_s11, %s798_s12  }
  0x14   :  { %s799_s15 = smov [#allocation2]   ;;  %s800_s17 = smov [#allocation7]  }
  0x15   :  { %s22_s16 = sshll.u32 %s799_s15, 4  ;;  %s45_s18 = sshll.u32 %s800_s17, 4  ;;  %s23_s16 = int_to_ptr.vmem [resolvable:$true] %s22_s16  ;;  %s46_s18 = int_to_ptr.vmem [resolvable:$true] %s45_s18 }
  0x16   :  { %s700_s21 = scalar_lea.hbm %s963_s0, 128 }
  0x17   :  { %p701_p8 = scmp.ne.s32.totalorder %s963_s0, %s700_s21  ;;  %p704_p9 = scmp.lt.u32.totalorder %s700_s21, %s963_s0 }
  0x19   :  { %p706_p10 = pnand %p704_p9, %p701_p8 }
  0x1b   :  { %709 = shalt.err (!%p706_p10)
}
  0x1c   :  { %s710_s1 = scalar_lea.vmem %s23_s16, 128  ;;  %p715_p12 = scmp.lt.s32.totalorder %s23_s16, %s23_s16 }
  0x1d   :  { %p711_p11 = scmp.ne.s32.totalorder %s23_s16, %s710_s1  ;;  %p716_p13 = scmp.lt.s32.totalorder %s710_s1, %s710_s1 }
  0x1f   :  { %p717_p0 = por %p716_p13, %p715_p12 }
  0x21   :  { %p718_p1 = pnand %p717_p0, %p711_p11 }
  0x23   :  { %721 = shalt.err (!%p718_p1)
}
  0x24   :  { %25 = dma.hbm_to_vmem [thread:$0]  %s963_s0, 128, %s23_s16, [#allocation3]  }
  0x25   :  { %s722_s30 = scalar_lea.hbm %s966_s3, 2048 }
  0x26   :  { %p723_p2 = scmp.ne.s32.totalorder %s966_s3, %s722_s30  ;;  %p726_p3 = scmp.lt.u32.totalorder %s722_s30, %s966_s3 }
  0x28   :  { %p728_p4 = pnand %p726_p3, %p723_p2 }
  0x2a   :  { %731 = shalt.err (!%p728_p4)
}
  0x2b   :  { %s732_s14 = scalar_lea.vmem %s46_s18, 2048  ;;  %p737_p6 = scmp.lt.s32.totalorder %s46_s18, %s46_s18 }
  0x2c   :  { %p733_p5 = scmp.ne.s32.totalorder %s46_s18, %s732_s14  ;;  %p738_p7 = scmp.lt.s32.totalorder %s732_s14, %s732_s14 }
  0x2e   :  { %p739_p8 = por %p738_p7, %p737_p6 }
  0x30   :  { %p740_p9 = pnand %p739_p8, %p733_p5 }
  0x32   :  { %743 = shalt.err (!%p740_p9)
}
  0x33   :  { %51 = dma.hbm_to_vmem [thread:$0]  %s966_s3, 2048, %s46_s18, [#allocation6], %s797_s11, %s797_s11, %s798_s12  }
  0x34   :  { %s801_s16 = smov [#allocation8]   ;;  %s744_s21 = scalar_lea.hbm %s968_s5, 2048 }
  0x35   :  { %s59_s17 = sshll.u32 %s801_s16, 4  ;;  %p745_p10 = scmp.ne.s32.totalorder %s968_s5, %s744_s21  ;;  %s60_s17 = int_to_ptr.vmem [resolvable:$true] %s59_s17 }
  0x36   :  { %p748_p11 = scmp.lt.u32.totalorder %s744_s21, %s968_s5 }
  0x38   :  { %p750_p12 = pnand %p748_p11, %p745_p10 }
  0x3a   :  { %753 = shalt.err (!%p750_p12)
}
  0x3b   :  { %s754_s1 = scalar_lea.vmem %s60_s17, 2048  ;;  %p759_p0 = scmp.lt.s32.totalorder %s60_s17, %s60_s17 }
  0x3c   :  { %p755_p13 = scmp.ne.s32.totalorder %s60_s17, %s754_s1  ;;  %p760_p1 = scmp.lt.s32.totalorder %s754_s1, %s754_s1 }
  0x3e   :  { %p761_p2 = por %p760_p1, %p759_p0 }
  0x40   :  { %p762_p3 = pnand %p761_p2, %p755_p13 }
  0x42   :  { %765 = shalt.err (!%p762_p3)
}
  0x43   :  { %65 = dma.hbm_to_vmem [thread:$0]  %s968_s5, 2048, %s60_s17, [#allocation9], %s797_s11, %s797_s11, %s798_s12  }
  0x44   :  { %788 = dma.done.wait [#allocation3], 128  }
  0x45   :  { %789 = vsyncadd [#allocation3], 4294967168 }
  0x46   :  { %790 = dma.done.wait [#allocation6], 4096  }
  0x47   :  { %791 = vsyncadd [#allocation6], 4294963200 }
  0x48   :  { %792 = dma.done.wait [#allocation9], 2048  }
  0x49   :  { %793 = vsyncadd [#allocation9], 4294965248  ;;  %v802_v0 = vmov 0.0|0.0   ;;  %vm803_vm0 = vmmov 0   ;;  %v804_v1 = vmov 0.0   ;;  %v81_v2 = vld [vmem:[#allocation5] sm:$0xff] }
  0x4a   :  { %590 = vmatprep.subr.bf16.mxu0 %v802_v0  ;;  %517 = vmatprep.mubr.msk.f32.mxu0 %vm803_vm0, %v804_v1  ;;  %v82_v3 = vld [vmem:[#allocation5 + $0x8] sm:$0xff]  ;;  %v83_v4 = vld [vmem:[#allocation5 + $0x10] sm:$0xff]  ;;  %v84_v6 = vld [vmem:[#allocation5 + $0x18] sm:$0xff]  ;;  %s805_s0 = smov [#allocation10]  }
  0x4b   :  { %614 = vmatprep.subr.bf16.mxu1 %v802_v0  ;;  %552 = vmatprep.mubr.msk.f32.mxu1 %vm803_vm0, %v804_v1  ;;  %v591_v5 = vpack.c.bf16 %v82_v3, %v81_v2  ;;  %v594_v7 = vpack.c.bf16 %v84_v6, %v83_v4  ;;  %v85_v8 = vld [vmem:[#allocation5 + $0x20] sm:$0xff]  ;;  %v86_v9 = vld [vmem:[#allocation5 + $0x28] sm:$0xff]  ;;  %v87_v11 = vld [vmem:[#allocation5 + $0x30] sm:$0xff]  ;;  %s416_s15 = sshll.u32 %s805_s0, 4  ;;  %s417_s15 = int_to_ptr.vmem [resolvable:$true] %s416_s15 }
  0x4c   :  { %v597_v10 = vpack.c.bf16 %v86_v9, %v85_v8  ;;  %v88_v12 = vld [vmem:[#allocation5 + $0x38] sm:$0xff]  ;;  %v89_v14 = vld [vmem:[#allocation5 + $0x40] sm:$0xff]  ;;  %v90_v15 = vld [vmem:[#allocation5 + $0x48] sm:$0xff]  ;;  %s766_s16 = scalar_lea.vmem %s417_s15, 128  ;;  %p771_p5 = scmp.lt.s32.totalorder %s417_s15, %s417_s15 }
  0x4d   :  { %592 = vmatpush3.bf16.msra.mxu0 %v591_v5  ;;  %v600_v13 = vpack.c.bf16 %v88_v12, %v87_v11  ;;  %v603_v16 = vpack.c.bf16 %v90_v15, %v89_v14  ;;  %v91_v17 = vld [vmem:[#allocation5 + $0x50] sm:$0xff]  ;;  %v92_v18 = vld [vmem:[#allocation5 + $0x58] sm:$0xff]  ;;  %v93_v20 = vld [vmem:[#allocation5 + $0x60] sm:$0xff]  ;;  %p767_p4 = scmp.ne.s32.totalorder %s417_s15, %s766_s16  ;;  %p772_p6 = scmp.lt.s32.totalorder %s766_s16, %s766_s16 }
  0x4e   :  { %593 = vmatprep.subr.bf16.mxu0 %v802_v0  ;;  %v606_v19 = vpack.c.bf16 %v92_v18, %v91_v17  ;;  %v94_v21 = vld [vmem:[#allocation5 + $0x68] sm:$0xff]  ;;  %v95_v23 = vld [vmem:[#allocation5 + $0x70] sm:$0xff]  ;;  %v96_v24 = vld [vmem:[#allocation5 + $0x78] sm:$0xff] }
  0x4f   :  { %v609_v22 = vpack.c.bf16 %v94_v21, %v93_v20  ;;  %v612_v25 = vpack.c.bf16 %v96_v24, %v95_v23  ;;  %v80_v26 = vld [vmem:[#allocation2] sm:$0xff]  ;;  %v198_v27 = vld [vmem:[#allocation7] sm:$0xff]  ;;  %v199_v28 = vld [vmem:[#allocation7 + $0x8] sm:$0xff]  ;;  %p773_p7 = por %p772_p6, %p771_p5 }
  0x50   :  { %v615_v29 = vpack.c.bf16 %v199_v28, %v198_v27  ;;  %v427_v30 = vld [vmem:[%s965_s2] ss:$0 sm:$0xff]  ;;  %v200_v35 = vld [vmem:[#allocation7 + $0x10] sm:$0xff]  ;;  %v202_v38 = vld [vmem:[#allocation7 + $0x20] sm:$0xff] }
  0x51   :  { %595 = vmatpush3.bf16.msra.mxu0 %v594_v7  ;;  %v201_v36 = vld [vmem:[#allocation7 + $0x18] sm:$0xff]  ;;  %v203_v39 = vld [vmem:[#allocation7 + $0x28] sm:$0xff]  ;;  %v204_v41 = vld [vmem:[#allocation7 + $0x30] sm:$0xff]  ;;  %p774_p8 = pnand %p773_p7, %p767_p4 }
  0x52   :  { %596 = vmatprep.subr.bf16.mxu0 %v802_v0  ;;  %616 = vmatpush3.bf16.msra.mxu1 %v615_v29  ;;  %v618_v37 = vpack.c.bf16 %v201_v36, %v200_v35  ;;  %v621_v40 = vpack.c.bf16 %v203_v39, %v202_v38  ;;  %v205_v42 = vld [vmem:[#allocation7 + $0x38] sm:$0xff]  ;;  %v206_v44 = vld [vmem:[#allocation7 + $0x40] sm:$0xff]  ;;  %v207_v45 = vld [vmem:[#allocation7 + $0x48] sm:$0xff] }
  0x53   :  { %617 = vmatprep.subr.bf16.mxu1 %v802_v0  ;;  %v624_v43 = vpack.c.bf16 %v205_v42, %v204_v41  ;;  %v627_v46 = vpack.c.bf16 %v207_v45, %v206_v44  ;;  %v208_v47 = vld [vmem:[#allocation7 + $0x50] sm:$0xff]  ;;  %v209_v48 = vld [vmem:[#allocation7 + $0x58] sm:$0xff]  ;;  %v210_v50 = vld [vmem:[#allocation7 + $0x60] sm:$0xff] }
  0x54   :  { %v630_v49 = vpack.c.bf16 %v209_v48, %v208_v47  ;;  %v211_v51 = vld [vmem:[#allocation7 + $0x68] sm:$0xff]  ;;  %v212_v53 = vld [vmem:[#allocation7 + $0x70] sm:$0xff]  ;;  %v213_v54 = vld [vmem:[#allocation7 + $0x78] sm:$0xff] }
  0x55   :  { %598 = vmatpush3.bf16.msra.mxu0 %v597_v10  ;;  %v633_v52 = vpack.c.bf16 %v211_v51, %v210_v50  ;;  %v636_v55 = vpack.c.bf16 %v213_v54, %v212_v53  ;;  %v428_v2 = vld [vmem:[%s965_s2 + $0x1] ss:$0 sm:$0xff]  ;;  %v429_v4 = vld [vmem:[%s965_s2 + $0x2] ss:$0 sm:$0xff]  ;;  %v315_v8 = vld [vmem:[#allocation8] sm:$0xff] }
  0x56   :  { %599 = vmatprep.subr.bf16.mxu0 %v802_v0  ;;  %619 = vmatpush3.bf16.msra.mxu1 %v618_v37  ;;  %v316_v9 = vld [vmem:[#allocation8 + $0x8] sm:$0xff]  ;;  %v430_v11 = vld [vmem:[%s967_s4] ss:$0 sm:$0xff]  ;;  %v325_v28 = vld [vmem:[#allocation8 + $0x50] sm:$0xff] }
  0x57   :  { %620 = vmatprep.subr.bf16.mxu1 %v802_v0  ;;  %v639_v10 = vpack.c.bf16 %v316_v9, %v315_v8  ;;  %v318_v17 = vld [vmem:[#allocation8 + $0x18] sm:$0xff]  ;;  %v320_v20 = vld [vmem:[#allocation8 + $0x28] sm:$0xff] }
  0x58   :  { %v322_v23 = vld [vmem:[#allocation8 + $0x38] sm:$0xff] }
  0x59   :  { %601 = vmatpush3.bf16.msra.mxu0 %v600_v13  ;;  %v326_v29 = vld [vmem:[#allocation8 + $0x58] sm:$0xff] }
  0x5a   :  { %602 = vmatprep.subr.bf16.mxu0 %v802_v0  ;;  %622 = vmatpush3.bf16.msra.mxu1 %v621_v40  ;;  %v330_v35 = vld [vmem:[#allocation8 + $0x78] sm:$0xff] }
  0x5b   :  { %623 = vmatprep.subr.bf16.mxu1 %v802_v0  ;;  %v433_v51 = vld [vmem:[%s969_s6] ss:$0 sm:$0xff] }
  0x5d   :  { %604 = vmatpush3.bf16.msra.mxu0 %v603_v16  ;;  %v317_v16 = vld [vmem:[#allocation8 + $0x10] sm:$0xff] }
  0x5e   :  { %605 = vmatprep.subr.bf16.mxu0 %v802_v0  ;;  %625 = vmatpush3.bf16.msra.mxu1 %v624_v43  ;;  %v642_v18 = vpack.c.bf16 %v318_v17, %v317_v16 }
  0x5f   :  { %626 = vmatprep.subr.bf16.mxu1 %v802_v0 }
  0x61   :  { %607 = vmatpush3.bf16.msra.mxu0 %v606_v19  ;;  %v319_v19 = vld [vmem:[#allocation8 + $0x20] sm:$0xff] }
  0x62   :  { %608 = vmatprep.subr.bf16.mxu0 %v802_v0  ;;  %628 = vmatpush3.bf16.msra.mxu1 %v627_v46  ;;  %v645_v21 = vpack.c.bf16 %v320_v20, %v319_v19  ;;  %v431_v46 = vld [vmem:[%s967_s4 + $0x1] ss:$0 sm:$0xff] }
  0x63   :  { %629 = vmatprep.subr.bf16.mxu1 %v802_v0 }
  0x65   :  { %610 = vmatpush3.bf16.msra.mxu0 %v609_v22  ;;  %v321_v22 = vld [vmem:[#allocation8 + $0x30] sm:$0xff] }
  0x66   :  { %611 = vmatprep.subr.bf16.mxu0 %v802_v0  ;;  %631 = vmatpush3.bf16.msra.mxu1 %v630_v49  ;;  %v648_v24 = vpack.c.bf16 %v322_v23, %v321_v22 }
  0x67   :  { %632 = vmatprep.subr.bf16.mxu1 %v802_v0 }
  0x69   :  { %613 = vmatpush3.bf16.msra.mxu0 %v612_v25  ;;  %v323_v25 = vld [vmem:[#allocation8 + $0x40] sm:$0xff] }
  0x6a   :  { %638 = vmatprep.subr.bf16.mxu0 %v802_v0  ;;  %634 = vmatpush3.bf16.msra.mxu1 %v633_v52 }
  0x6b   :  { %635 = vmatprep.subr.bf16.mxu1 %v802_v0 }
  0x6c   :  { %518 = vmatmul.mubr.f32.vlgmr.msra.gmra.mrb[0].mxu0 %v80_v26  ;;  %v324_v26 = vld [vmem:[#allocation8 + $0x48] sm:$0xff] }
  0x6d   :  { %587 = vmatprep.mubr.msk.f32.mxu0 %vm803_vm0, %v804_v1  ;;  %640 = vmatpush3.bf16.msra.mxu0 %v639_v10  ;;  %v651_v27 = vpack.c.bf16 %v324_v26, %v323_v25 }
  0x6e   :  { %637 = vmatpush3.bf16.msra.mxu1 %v636_v55  ;;  %641 = vmatprep.subr.bf16.mxu0 %v802_v0 }
  0x71   :  { %643 = vmatpush3.bf16.msra.mxu0 %v642_v18 }
  0x72   :  { %644 = vmatprep.subr.bf16.mxu0 %v802_v0 }
  0x75   :  { %646 = vmatpush3.bf16.msra.mxu0 %v645_v21 }
  0x76   :  { %647 = vmatprep.subr.bf16.mxu0 %v802_v0 }
  0x79   :  { %649 = vmatpush3.bf16.msra.mxu0 %v648_v24 }
  0x7a   :  { %650 = vmatprep.subr.bf16.mxu0 %v802_v0 }
  0x7d   :  { %652 = vmatpush3.bf16.msra.mxu0 %v651_v27 }
  0x7e   :  { %653 = vmatprep.subr.bf16.mxu0 %v802_v0 }
 0x13f   :  { %v168_v31 = vpop.f32.mrb[0].mxu0 }
 0x140   :  { %v169_v32 = vadd.f32 %v427_v30, %v168_v31  ;;  %v519_v33 = vpop.f32.mrb[1].mxu0  ;;  %v654_v30 = vpack.c.bf16 %v326_v29, %v325_v28  ;;  %v327_v31 = vld [vmem:[#allocation8 + $0x60] sm:$0xff] }
 0x142   :  { %174 = vadd.xlane.f32.xlu0 %v169_v32  ;;  %v176_v34 = vmul.f32 %v169_v32, %v169_v32  ;;  %655 = vmatpush3.bf16.msra.mxu0 %v654_v30 }
 0x143   :  { %656 = vmatprep.subr.bf16.mxu0 %v802_v0 }
 0x146   :  { %177 = vadd.xlane.f32.xlu0 %v176_v34  ;;  %v329_v34 = vld [vmem:[#allocation8 + $0x70] sm:$0xff] }
 0x147   :  { %v660_v36 = vpack.c.bf16 %v330_v35, %v329_v34 }
 0x1cf   :  { %v175_v56 = vpop.xlane.xlu0 %174 }
 0x1d0   :  { %v179_v57 = vmul.f32 0.03125, %v175_v56 }
 0x1d2   :  { %v181_v59 = vmul.f32 %v179_v57, %v179_v57  ;;  %v183_v63 = vsub.f32 %v169_v32, %v179_v57  ;;  %v328_v32 = vld [vmem:[#allocation8 + $0x68] sm:$0xff] }
 0x1d3   :  { %v178_v58 = vpop.xlane.xlu0 %177  ;;  %v657_v33 = vpack.c.bf16 %v328_v32, %v327_v31 }
 0x1d4   :  { %v180_v60 = vmul.f32 0.03125, %v178_v58 }
 0x1d5   :  { %658 = vmatpush3.bf16.msra.mxu0 %v657_v33 }
 0x1d6   :  { %v182_v61 = vsub.f32 %v180_v60, %v181_v59  ;;  %659 = vmatprep.subr.bf16.mxu0 %v802_v0  ;;  %v432_v0 = vld [vmem:[%s967_s4 + $0x2] ss:$0 sm:$0xff] }
 0x1d8   :  { %v184_v62 = vadd.f32 1e-05, %v182_v61 }
 0x1d9   :  { %661 = vmatpush3.bf16.msra.mxu0 %v660_v36 }
 0x1da   :  { %672 = vrsqrt.f32 %v184_v62 }
 0x1e4   :  { %v673_v1 = vpop.eup %672 }
 0x1e5   :  { %v186_v3 = vmul.f32 %v673_v1, %v183_v63 }
 0x1e7   :  { %v191_v5 = vmul.f32 %v428_v2, %v186_v3 }
 0x1e9   :  { %v196_v6 = vadd.f32 %v429_v4, %v191_v5 }
 0x1eb   :  { %v197_v7 = vmax.f32 %v196_v6, 0.0 }
 0x1ed   :  { %553 = vmatmul.mubr.f32.vlgmr.msra.gmra.mrb[0].mxu1 %v197_v7 }
 0x2c0   :  { %v285_v12 = vpop.f32.mrb[0].mxu1 }
 0x2c1   :  { %v286_v13 = vadd.f32 %v430_v11, %v285_v12  ;;  %v554_v14 = vpop.f32.mrb[1].mxu1 }
 0x2c3   :  { %291 = vadd.xlane.f32.xlu1 %v286_v13  ;;  %v293_v15 = vmul.f32 %v286_v13, %v286_v13 }
 0x2c7   :  { %294 = vadd.xlane.f32.xlu1 %v293_v15 }
 0x350   :  { %v292_v37 = vpop.xlane.xlu1 %291 }
 0x351   :  { %v296_v38 = vmul.f32 0.03125, %v292_v37 }
 0x353   :  { %v298_v40 = vmul.f32 %v296_v38, %v296_v38  ;;  %v300_v44 = vsub.f32 %v286_v13, %v296_v38 }
 0x354   :  { %v295_v39 = vpop.xlane.xlu1 %294 }
 0x355   :  { %v297_v41 = vmul.f32 0.03125, %v295_v39 }
 0x357   :  { %v299_v42 = vsub.f32 %v297_v41, %v298_v40 }
 0x359   :  { %v301_v43 = vadd.f32 1e-05, %v299_v42 }
 0x35b   :  { %674 = vrsqrt.f32 %v301_v43 }
 0x365   :  { %v675_v45 = vpop.eup %674 }
 0x366   :  { %v303_v47 = vmul.f32 %v675_v45, %v300_v44 }
 0x368   :  { %v308_v48 = vmul.f32 %v431_v46, %v303_v47 }
 0x36a   :  { %v313_v49 = vadd.f32 %v432_v0, %v308_v48 }
 0x36c   :  { %v314_v50 = vmax.f32 %v313_v49, 0.0 }
 0x36e   :  { %588 = vmatmul.mubr.f32.vlgmr.msra.gmra.mrb[2].mxu0 %v314_v50 }
 0x441   :  { %v404_v52 = vpop.f32.mrb[2].mxu0 }
 0x442   :  { %v405_v53 = vadd.f32 %v433_v51, %v404_v52  ;;  %v589_v54 = vpop.f32.mrb[3].mxu0 }
 0x444   :  { %676 = vtanh.f32 %v405_v53 }
 0x44e   :  { %v677_v55 = vpop.eup %676 }
 0x44f   :  { %409 = vst [vmem:[#allocation10] sm:$0xff] %v677_v55 }
 0x450   :  { %777 = shalt.err (!%p774_p8)
}
 0x451   :  { %s778_s6 = scalar_lea.hbm %s970_s7, 128 }
 0x452   :  { %p779_p9 = scmp.ne.s32.totalorder %s970_s7, %s778_s6  ;;  %p782_p10 = scmp.lt.u32.totalorder %s778_s6, %s970_s7 }
 0x454   :  { %p784_p11 = pnand %p782_p10, %p779_p9 }
 0x456   :  { %787 = shalt.err (!%p784_p11)
}
 0x457   :  { %419 = dma.vmem_to_hbm [thread:$0]  %s417_s15, 128, %s970_s7, [#allocation4]  }
 0x458   :  { %794 = dma.done.wait [#allocation4], 128  }
 0x459   :  { %795 = vsyncadd [#allocation4], 4294967168 }
 0x45a   :  { %423 = vsyncpa [#allocation3], 1 }
 0x45b   :  { %424 = vsyncpa [#allocation6], 1 }
 0x45c   :  { %425 = vsyncpa [#allocation9], 1 }
 0x45d   :  { %426 = vsyncpa [#allocation4], 1 }

</bundles_post_ra>
